<compile_context>
chip_gen: v5e
topology: v5e:2x2
jax: 0.10.0
libtpu: 0.0.40
codegen_flags: <defaults>
</compile_context>

<pallas_src>
import functools

import jax
import jax.numpy as jnp
from jax.experimental import pallas as pl
from jax.experimental.pallas import tpu as pltpu


def time_mixing_kernel(x_ref, w_ref, b_ref, scale_ref, shift_ref, o_ref, *, matmul_dtype):
    # x_ref / o_ref blocks: (TB, S, C) in the array's natural layout (contiguous in HBM).
    w = w_ref[...]           # (S, S)  fc1 weight, resident across the whole grid
    bias = b_ref[...]        # (S, C)  fc1 bias, pre-broadcast in the wrapper
    scale = scale_ref[...]   # (S, C)  folded BN scale
    shift = shift_ref[...]   # (S, C)  folded BN shift
    tb = x_ref.shape[0]

    def one_sample(n, carry):
        xb = x_ref[n].astype(jnp.float32)                       # (S, C)
        if matmul_dtype is None:
            yb = jnp.dot(w, xb, preferred_element_type=jnp.float32,
                         precision=jax.lax.Precision.HIGHEST)
        else:  # compute-bound (very large S) option
            yb = jnp.dot(w.astype(matmul_dtype), xb.astype(matmul_dtype),
                         preferred_element_type=jnp.float32)
        yb = jnp.maximum(yb + bias, 0.0)        # fc1 bias + ReLU; dropout = identity (eval)
        zb = xb + yb                            # residual: x + x_res
        o_ref[n] = (zb * scale + shift).astype(o_ref.dtype)      # folded BatchNorm (eval)
        return carry

    jax.lax.fori_loop(0, tb, one_sample, 0, unroll=(tb <= 8))


def _choose_batch_tile(N, S, C, x_itemsize, out_itemsize, resident_bytes,
                       vmem_budget_bytes, min_even_block_bytes=512 * 1024):
    """Largest TB dividing N whose double-buffered (TB,S,C) x/out blocks plus the
    (double-buffered) residents fit the VMEM budget. Prefer an even grid (>=2 steps)
    when each x block can stay >= min_even_block_bytes so the 'parallel' batch axis
    keeps both TensorCores of a v7x busy; on 1-TC chips (v5e/v6e) this costs ~nothing."""
    def x_block_bytes(tb):
        return tb * S * C * x_itemsize

    def footprint(tb):
        return 2 * tb * S * C * (x_itemsize + out_itemsize) + 2 * resident_bytes

    divisors = [d for d in range(1, N + 1) if N % d == 0]
    valid = [tb for tb in divisors if footprint(tb) <= vmem_budget_bytes]
    if not valid:
        valid = [1]   # extreme S*C: single-sample blocks; rely on vmem_limit headroom
    even = [tb for tb in valid
            if (N // tb) >= 2 and (N // tb) % 2 == 0
            and x_block_bytes(tb) >= min_even_block_bytes]
    return max(even) if even else max(valid)


def time_mixing(x, w, b, gamma, beta, run_mean, run_var, eps=1e-5,
                *, matmul_dtype=None,
                vmem_budget_bytes=40 * 1024 * 1024,
                vmem_limit_bytes=48 * 1024 * 1024):
    """x: (N, S, C) float32 or bfloat16. w: (S, S) fc1 weight (PyTorch convention
    y = x @ w.T + b), b: (S,). gamma/beta/run_mean/run_var: (S*C,) BN params / stats."""
    N, S, C = x.shape
    f32 = jnp.float32

    # Fold BatchNorm running stats (eval mode) into per-(s, c) scale/shift.
    inv_std = (gamma.astype(f32) / jnp.sqrt(run_var.astype(f32) + eps))
    scale = inv_std.reshape(S, C)
    shift = (beta.astype(f32) - run_mean.astype(f32) * inv_std).reshape(S, C)
    bias = jnp.broadcast_to(b.astype(f32).reshape(S, 1), (S, C))   # pre-broadcast fc1 bias
    w32 = w.astype(f32)

    itemsize = jnp.dtype(x.dtype).itemsize
    resident_bytes = (S * S + 3 * S * C) * 4
    TB = _choose_batch_tile(N, S, C, itemsize, itemsize, resident_bytes, vmem_budget_bytes)
    n_blocks = N // TB

    kernel = functools.partial(time_mixing_kernel, matmul_dtype=matmul_dtype)

    return pl.pallas_call(
        kernel,
        out_shape=jax.ShapeDtypeStruct((N, S, C), x.dtype),
        grid_spec=pltpu.PrefetchScalarGridSpec(
            num_scalar_prefetch=0,
            grid=(n_blocks,),
            in_specs=[
                pl.BlockSpec((TB, S, C), lambda i: (i, 0, 0)),  # x batch tile (contiguous HBM)
                pl.BlockSpec((S, S), lambda i: (0, 0)),         # fc1 weight, resident
                pl.BlockSpec((S, C), lambda i: (0, 0)),         # fc1 bias, resident
                pl.BlockSpec((S, C), lambda i: (0, 0)),         # BN scale, resident
                pl.BlockSpec((S, C), lambda i: (0, 0)),         # BN shift, resident
            ],
            out_specs=pl.BlockSpec((TB, S, C), lambda i: (i, 0, 0)),
        ),
        compiler_params=pltpu.CompilerParams(
            dimension_semantics=("parallel",),
            vmem_limit_bytes=vmem_limit_bytes,
        ),
    )(x, w32, bias, scale, shift)


def time_mixing_ref(x, w, b, gamma, beta, run_mean, run_var, eps=1e-5):
    """Pure-JAX reference mirroring the PyTorch module (eval mode)."""
    N, S, C = x.shape
    xf = x.astype(jnp.float32)
    x_t = jnp.transpose(xf, (0, 2, 1))                 # feature_to_time: (N, C, S)
    y = jnp.einsum("ncs,ts->nct", x_t, w,
                   precision=jax.lax.Precision.HIGHEST) + b     # fc1: Linear(S, S)
    y = jnp.maximum(y, 0.0)                            # ReLU; dropout identity (eval)
    x_res = jnp.transpose(y, (0, 2, 1))                # time_to_feature: (N, S, C)
    z = xf + x_res
    zf = z.reshape(N, S * C)                           # TimeBatchNorm2d flatten
    zn = (zf - run_mean) / jnp.sqrt(run_var + eps) * gamma + beta
    return zn.reshape(N, S, C)


if __name__ == "__main__":
    N, S, C = 8, 8, 32   # batch, sequence_length, input_channels (small demo shapes)
    key = jax.random.PRNGKey(0)
    kx, kw, kb, kg, kbe, km, kv = jax.random.split(key, 7)

    x = jax.random.normal(kx, (N, S, C), dtype=jnp.float32)

    # nn.Linear(S, S) default init: U(-1/sqrt(S), 1/sqrt(S))
    bound = 1.0 / jnp.sqrt(jnp.float32(S))
    w = jax.random.uniform(kw, (S, S), jnp.float32, -bound, bound)
    b = jax.random.uniform(kb, (S,), jnp.float32, -bound, bound)

    # TimeBatchNorm2d (BatchNorm1d over S*C features): synthetic affine + running stats.
    gamma = jax.random.uniform(kg, (S * C,), jnp.float32, 0.5, 1.5)
    beta = jax.random.normal(kbe, (S * C,), jnp.float32) * 0.1
    run_mean = jax.random.normal(km, (S * C,), jnp.float32) * 0.1
    run_var = jax.random.uniform(kv, (S * C,), jnp.float32, 0.5, 1.5)

    ref = time_mixing_ref(x, w, b, gamma, beta, run_mean, run_var)

    # 1) Default tiling: TB as large as the (double-buffered) VMEM budget allows.
    out = jax.block_until_ready(time_mixing(x, w, b, gamma, beta, run_mean, run_var))
    assert out.shape == (N, S, C) and out.dtype == jnp.float32
    assert jnp.allclose(out, ref, atol=1e-5, rtol=1e-5)

    # 2) Tiny VMEM budget -> multi-step grid (exercises the batch-tile index_map).
    out_small = jax.block_until_ready(
        time_mixing(x, w, b, gamma, beta, run_mean, run_var,
                    vmem_budget_bytes=16 * 1024))
    assert jnp.allclose(out_small, ref, atol=1e-5, rtol=1e-5)

    # 3) bf16 I/O smoke test (halves HBM bytes; math stays in f32 inside the kernel).
    out_bf16 = jax.block_until_ready(
        time_mixing(x.astype(jnp.bfloat16), w, b, gamma, beta, run_mean, run_var))
    assert out_bf16.shape == (N, S, C) and out_bf16.dtype == jnp.bfloat16
    assert bool(jnp.all(jnp.isfinite(out_bf16.astype(jnp.float32))))

    print("KERNEL_OK")
</pallas_src>

<mosaic_0001>
module attributes {stable_mosaic.version = 11 : i64} {
  func.func @time_mixing_kernel(%arg0: i32, %arg1: memref<8x8x32xf32, #tpu.memory_space<vmem>>, %arg2: memref<8x8xf32, #tpu.memory_space<vmem>>, %arg3: memref<8x32xf32, #tpu.memory_space<vmem>>, %arg4: memref<8x32xf32, #tpu.memory_space<vmem>>, %arg5: memref<8x32xf32, #tpu.memory_space<vmem>>, %arg6: memref<8x8x32xf32, #tpu.memory_space<vmem>>) attributes {dimension_semantics = [#tpu.dimension_semantics<parallel>], iteration_bounds = array<i64: 1>, scalar_prefetch = 0 : i64, scratch_operands = 0 : i64, tpu.core_type = #tpu.core_type<tc>, window_params = [{transform_indices = @transform_0, window_bounds = array<i64: 8, 8, 32>}, {pipeline_mode = #tpu.pipeline_mode<synchronous>, transform_indices = @transform_1, window_bounds = array<i64: 8, 8>}, {pipeline_mode = #tpu.pipeline_mode<synchronous>, transform_indices = @transform_2, window_bounds = array<i64: 8, 32>}, {pipeline_mode = #tpu.pipeline_mode<synchronous>, transform_indices = @transform_3, window_bounds = array<i64: 8, 32>}, {pipeline_mode = #tpu.pipeline_mode<synchronous>, transform_indices = @transform_4, window_bounds = array<i64: 8, 32>}, {transform_indices = @transform_5, window_bounds = array<i64: 8, 8, 32>}]} {
    %c0 = arith.constant 0 : index
    %c0_0 = arith.constant 0 : index
    %0 = vector.load %arg2[%c0, %c0_0] : memref<8x8xf32, #tpu.memory_space<vmem>>, vector<8x8xf32>
    %c0_1 = arith.constant 0 : index
    %c0_2 = arith.constant 0 : index
    %1 = vector.load %arg3[%c0_1, %c0_2] : memref<8x32xf32, #tpu.memory_space<vmem>>, vector<8x32xf32>
    %c0_3 = arith.constant 0 : index
    %c0_4 = arith.constant 0 : index
    %2 = vector.load %arg4[%c0_3, %c0_4] : memref<8x32xf32, #tpu.memory_space<vmem>>, vector<8x32xf32>
    %c0_5 = arith.constant 0 : index
    %c0_6 = arith.constant 0 : index
    %3 = vector.load %arg5[%c0_5, %c0_6] : memref<8x32xf32, #tpu.memory_space<vmem>>, vector<8x32xf32>
    %c0_i32 = arith.constant 0 : i32
    %4 = arith.index_cast %c0_i32 : i32 to index
    %c0_7 = arith.constant 0 : index
    %c0_8 = arith.constant 0 : index
    %5 = vector.load %arg1[%4, %c0_7, %c0_8] : memref<8x8x32xf32, #tpu.memory_space<vmem>>, vector<1x8x32xf32>
    %6 = vector.shape_cast %5 : vector<1x8x32xf32> to vector<8x32xf32>
    %cst = arith.constant dense<0.000000e+00> : vector<8x32xf32>
    %7 = tpu.matmul %0, %6, %cst {dimension_numbers = #tpu.dot_dimension_numbers<[1], [0], [0], [1], [0, 0, 1, 1], [], []>, precision = #tpu.contract_precision<fp32>} : vector<8x8xf32>, vector<8x32xf32>, vector<8x32xf32> -> vector<8x32xf32>
    %8 = arith.addf %7, %1 : vector<8x32xf32>
    %cst_9 = arith.constant 0.000000e+00 : f32
    %9 = vector.broadcast %cst_9 : f32 to vector<8x32xf32>
    %10 = arith.maximumf %8, %9 : vector<8x32xf32>
    %11 = arith.addf %6, %10 : vector<8x32xf32>
    %12 = arith.mulf %11, %2 : vector<8x32xf32>
    %13 = arith.addf %12, %3 : vector<8x32xf32>
    %14 = arith.index_cast %c0_i32 : i32 to index
    %c0_10 = arith.constant 0 : index
    %c0_11 = arith.constant 0 : index
    %15 = vector.load %arg6[%14, %c0_10, %c0_11] : memref<8x8x32xf32, #tpu.memory_space<vmem>>, vector<1x8x32xf32>
    %16 = vector.shape_cast %15 : vector<1x8x32xf32> to vector<8x32xf32>
    %17 = vector.shape_cast %13 : vector<8x32xf32> to vector<1x8x32xf32>
    tpu.vector_store %arg6[%14, %c0_10, %c0_11], %17 {strides = array<i32>} : memref<8x8x32xf32, #tpu.memory_space<vmem>>, vector<1x8x32xf32>,
    %c1_i32 = arith.constant 1 : i32
    %18 = arith.index_cast %c1_i32 : i32 to index
    %c0_12 = arith.constant 0 : index
    %c0_13 = arith.constant 0 : index
    %19 = vector.load %arg1[%18, %c0_12, %c0_13] : memref<8x8x32xf32, #tpu.memory_space<vmem>>, vector<1x8x32xf32>
    %20 = vector.shape_cast %19 : vector<1x8x32xf32> to vector<8x32xf32>
    %cst_14 = arith.constant dense<0.000000e+00> : vector<8x32xf32>
    %21 = tpu.matmul %0, %20, %cst_14 {dimension_numbers = #tpu.dot_dimension_numbers<[1], [0], [0], [1], [0, 0, 1, 1], [], []>, precision = #tpu.contract_precision<fp32>} : vector<8x8xf32>, vector<8x32xf32>, vector<8x32xf32> -> vector<8x32xf32>
    %22 = arith.addf %21, %1 : vector<8x32xf32>
    %cst_15 = arith.constant 0.000000e+00 : f32
    %23 = vector.broadcast %cst_15 : f32 to vector<8x32xf32>
    %24 = arith.maximumf %22, %23 : vector<8x32xf32>
    %25 = arith.addf %20, %24 : vector<8x32xf32>
    %26 = arith.mulf %25, %2 : vector<8x32xf32>
    %27 = arith.addf %26, %3 : vector<8x32xf32>
    %28 = arith.index_cast %c1_i32 : i32 to index
    %c0_16 = arith.constant 0 : index
    %c0_17 = arith.constant 0 : index
    %29 = vector.load %arg6[%28, %c0_16, %c0_17] : memref<8x8x32xf32, #tpu.memory_space<vmem>>, vector<1x8x32xf32>
    %30 = vector.shape_cast %29 : vector<1x8x32xf32> to vector<8x32xf32>
    %31 = vector.shape_cast %27 : vector<8x32xf32> to vector<1x8x32xf32>
    tpu.vector_store %arg6[%28, %c0_16, %c0_17], %31 {strides = array<i32>} : memref<8x8x32xf32, #tpu.memory_space<vmem>>, vector<1x8x32xf32>,
    %c2_i32 = arith.constant 2 : i32
    %32 = arith.index_cast %c2_i32 : i32 to index
    %c0_18 = arith.constant 0 : index
    %c0_19 = arith.constant 0 : index
    %33 = vector.load %arg1[%32, %c0_18, %c0_19] : memref<8x8x32xf32, #tpu.memory_space<vmem>>, vector<1x8x32xf32>
    %34 = vector.shape_cast %33 : vector<1x8x32xf32> to vector<8x32xf32>
    %cst_20 = arith.constant dense<0.000000e+00> : vector<8x32xf32>
    %35 = tpu.matmul %0, %34, %cst_20 {dimension_numbers = #tpu.dot_dimension_numbers<[1], [0], [0], [1], [0, 0, 1, 1], [], []>, precision = #tpu.contract_precision<fp32>} : vector<8x8xf32>, vector<8x32xf32>, vector<8x32xf32> -> vector<8x32xf32>
    %36 = arith.addf %35, %1 : vector<8x32xf32>
    %cst_21 = arith.constant 0.000000e+00 : f32
    %37 = vector.broadcast %cst_21 : f32 to vector<8x32xf32>
    %38 = arith.maximumf %36, %37 : vector<8x32xf32>
    %39 = arith.addf %34, %38 : vector<8x32xf32>
    %40 = arith.mulf %39, %2 : vector<8x32xf32>
    %41 = arith.addf %40, %3 : vector<8x32xf32>
    %42 = arith.index_cast %c2_i32 : i32 to index
    %c0_22 = arith.constant 0 : index
    %c0_23 = arith.constant 0 : index
    %43 = vector.load %arg6[%42, %c0_22, %c0_23] : memref<8x8x32xf32, #tpu.memory_space<vmem>>, vector<1x8x32xf32>
    %44 = vector.shape_cast %43 : vector<1x8x32xf32> to vector<8x32xf32>
    %45 = vector.shape_cast %41 : vector<8x32xf32> to vector<1x8x32xf32>
    tpu.vector_store %arg6[%42, %c0_22, %c0_23], %45 {strides = array<i32>} : memref<8x8x32xf32, #tpu.memory_space<vmem>>, vector<1x8x32xf32>,
    %c3_i32 = arith.constant 3 : i32
    %46 = arith.index_cast %c3_i32 : i32 to index
    %c0_24 = arith.constant 0 : index
    %c0_25 = arith.constant 0 : index
    %47 = vector.load %arg1[%46, %c0_24, %c0_25] : memref<8x8x32xf32, #tpu.memory_space<vmem>>, vector<1x8x32xf32>
    %48 = vector.shape_cast %47 : vector<1x8x32xf32> to vector<8x32xf32>
    %cst_26 = arith.constant dense<0.000000e+00> : vector<8x32xf32>
    %49 = tpu.matmul %0, %48, %cst_26 {dimension_numbers = #tpu.dot_dimension_numbers<[1], [0], [0], [1], [0, 0, 1, 1], [], []>, precision = #tpu.contract_precision<fp32>} : vector<8x8xf32>, vector<8x32xf32>, vector<8x32xf32> -> vector<8x32xf32>
    %50 = arith.addf %49, %1 : vector<8x32xf32>
    %cst_27 = arith.constant 0.000000e+00 : f32
    %51 = vector.broadcast %cst_27 : f32 to vector<8x32xf32>
    %52 = arith.maximumf %50, %51 : vector<8x32xf32>
    %53 = arith.addf %48, %52 : vector<8x32xf32>
    %54 = arith.mulf %53, %2 : vector<8x32xf32>
    %55 = arith.addf %54, %3 : vector<8x32xf32>
    %56 = arith.index_cast %c3_i32 : i32 to index
    %c0_28 = arith.constant 0 : index
    %c0_29 = arith.constant 0 : index
    %57 = vector.load %arg6[%56, %c0_28, %c0_29] : memref<8x8x32xf32, #tpu.memory_space<vmem>>, vector<1x8x32xf32>
    %58 = vector.shape_cast %57 : vector<1x8x32xf32> to vector<8x32xf32>
    %59 = vector.shape_cast %55 : vector<8x32xf32> to vector<1x8x32xf32>
    tpu.vector_store %arg6[%56, %c0_28, %c0_29], %59 {strides = array<i32>} : memref<8x8x32xf32, #tpu.memory_space<vmem>>, vector<1x8x32xf32>,
    %c4_i32 = arith.constant 4 : i32
    %60 = arith.index_cast %c4_i32 : i32 to index
    %c0_30 = arith.constant 0 : index
    %c0_31 = arith.constant 0 : index
    %61 = vector.load %arg1[%60, %c0_30, %c0_31] : memref<8x8x32xf32, #tpu.memory_space<vmem>>, vector<1x8x32xf32>
    %62 = vector.shape_cast %61 : vector<1x8x32xf32> to vector<8x32xf32>
    %cst_32 = arith.constant dense<0.000000e+00> : vector<8x32xf32>
    %63 = tpu.matmul %0, %62, %cst_32 {dimension_numbers = #tpu.dot_dimension_numbers<[1], [0], [0], [1], [0, 0, 1, 1], [], []>, precision = #tpu.contract_precision<fp32>} : vector<8x8xf32>, vector<8x32xf32>, vector<8x32xf32> -> vector<8x32xf32>
    %64 = arith.addf %63, %1 : vector<8x32xf32>
    %cst_33 = arith.constant 0.000000e+00 : f32
    %65 = vector.broadcast %cst_33 : f32 to vector<8x32xf32>
    %66 = arith.maximumf %64, %65 : vector<8x32xf32>
    %67 = arith.addf %62, %66 : vector<8x32xf32>
    %68 = arith.mulf %67, %2 : vector<8x32xf32>
    %69 = arith.addf %68, %3 : vector<8x32xf32>
    %70 = arith.index_cast %c4_i32 : i32 to index
    %c0_34 = arith.constant 0 : index
    %c0_35 = arith.constant 0 : index
    %71 = vector.load %arg6[%70, %c0_34, %c0_35] : memref<8x8x32xf32, #tpu.memory_space<vmem>>, vector<1x8x32xf32>
    %72 = vector.shape_cast %71 : vector<1x8x32xf32> to vector<8x32xf32>
    %73 = vector.shape_cast %69 : vector<8x32xf32> to vector<1x8x32xf32>
    tpu.vector_store %arg6[%70, %c0_34, %c0_35], %73 {strides = array<i32>} : memref<8x8x32xf32, #tpu.memory_space<vmem>>, vector<1x8x32xf32>,
    %c5_i32 = arith.constant 5 : i32
    %74 = arith.index_cast %c5_i32 : i32 to index
    %c0_36 = arith.constant 0 : index
    %c0_37 = arith.constant 0 : index
    %75 = vector.load %arg1[%74, %c0_36, %c0_37] : memref<8x8x32xf32, #tpu.memory_space<vmem>>, vector<1x8x32xf32>
    %76 = vector.shape_cast %75 : vector<1x8x32xf32> to vector<8x32xf32>
    %cst_38 = arith.constant dense<0.000000e+00> : vector<8x32xf32>
    %77 = tpu.matmul %0, %76, %cst_38 {dimension_numbers = #tpu.dot_dimension_numbers<[1], [0], [0], [1], [0, 0, 1, 1], [], []>, precision = #tpu.contract_precision<fp32>} : vector<8x8xf32>, vector<8x32xf32>, vector<8x32xf32> -> vector<8x32xf32>
    %78 = arith.addf %77, %1 : vector<8x32xf32>
    %cst_39 = arith.constant 0.000000e+00 : f32
    %79 = vector.broadcast %cst_39 : f32 to vector<8x32xf32>
    %80 = arith.maximumf %78, %79 : vector<8x32xf32>
    %81 = arith.addf %76, %80 : vector<8x32xf32>
    %82 = arith.mulf %81, %2 : vector<8x32xf32>
    %83 = arith.addf %82, %3 : vector<8x32xf32>
    %84 = arith.index_cast %c5_i32 : i32 to index
    %c0_40 = arith.constant 0 : index
    %c0_41 = arith.constant 0 : index
    %85 = vector.load %arg6[%84, %c0_40, %c0_41] : memref<8x8x32xf32, #tpu.memory_space<vmem>>, vector<1x8x32xf32>
    %86 = vector.shape_cast %85 : vector<1x8x32xf32> to vector<8x32xf32>
    %87 = vector.shape_cast %83 : vector<8x32xf32> to vector<1x8x32xf32>
    tpu.vector_store %arg6[%84, %c0_40, %c0_41], %87 {strides = array<i32>} : memref<8x8x32xf32, #tpu.memory_space<vmem>>, vector<1x8x32xf32>,
    %c6_i32 = arith.constant 6 : i32
    %88 = arith.index_cast %c6_i32 : i32 to index
    %c0_42 = arith.constant 0 : index
    %c0_43 = arith.constant 0 : index
    %89 = vector.load %arg1[%88, %c0_42, %c0_43] : memref<8x8x32xf32, #tpu.memory_space<vmem>>, vector<1x8x32xf32>
    %90 = vector.shape_cast %89 : vector<1x8x32xf32> to vector<8x32xf32>
    %cst_44 = arith.constant dense<0.000000e+00> : vector<8x32xf32>
    %91 = tpu.matmul %0, %90, %cst_44 {dimension_numbers = #tpu.dot_dimension_numbers<[1], [0], [0], [1], [0, 0, 1, 1], [], []>, precision = #tpu.contract_precision<fp32>} : vector<8x8xf32>, vector<8x32xf32>, vector<8x32xf32> -> vector<8x32xf32>
    %92 = arith.addf %91, %1 : vector<8x32xf32>
    %cst_45 = arith.constant 0.000000e+00 : f32
    %93 = vector.broadcast %cst_45 : f32 to vector<8x32xf32>
    %94 = arith.maximumf %92, %93 : vector<8x32xf32>
    %95 = arith.addf %90, %94 : vector<8x32xf32>
    %96 = arith.mulf %95, %2 : vector<8x32xf32>
    %97 = arith.addf %96, %3 : vector<8x32xf32>
    %98 = arith.index_cast %c6_i32 : i32 to index
    %c0_46 = arith.constant 0 : index
    %c0_47 = arith.constant 0 : index
    %99 = vector.load %arg6[%98, %c0_46, %c0_47] : memref<8x8x32xf32, #tpu.memory_space<vmem>>, vector<1x8x32xf32>
    %100 = vector.shape_cast %99 : vector<1x8x32xf32> to vector<8x32xf32>
    %101 = vector.shape_cast %97 : vector<8x32xf32> to vector<1x8x32xf32>
    tpu.vector_store %arg6[%98, %c0_46, %c0_47], %101 {strides = array<i32>} : memref<8x8x32xf32, #tpu.memory_space<vmem>>, vector<1x8x32xf32>,
    %c7_i32 = arith.constant 7 : i32
    %102 = arith.index_cast %c7_i32 : i32 to index
    %c0_48 = arith.constant 0 : index
    %c0_49 = arith.constant 0 : index
    %103 = vector.load %arg1[%102, %c0_48, %c0_49] : memref<8x8x32xf32, #tpu.memory_space<vmem>>, vector<1x8x32xf32>
    %104 = vector.shape_cast %103 : vector<1x8x32xf32> to vector<8x32xf32>
    %cst_50 = arith.constant dense<0.000000e+00> : vector<8x32xf32>
    %105 = tpu.matmul %0, %104, %cst_50 {dimension_numbers = #tpu.dot_dimension_numbers<[1], [0], [0], [1], [0, 0, 1, 1], [], []>, precision = #tpu.contract_precision<fp32>} : vector<8x8xf32>, vector<8x32xf32>, vector<8x32xf32> -> vector<8x32xf32>
    %106 = arith.addf %105, %1 : vector<8x32xf32>
    %cst_51 = arith.constant 0.000000e+00 : f32
    %107 = vector.broadcast %cst_51 : f32 to vector<8x32xf32>
    %108 = arith.maximumf %106, %107 : vector<8x32xf32>
    %109 = arith.addf %104, %108 : vector<8x32xf32>
    %110 = arith.mulf %109, %2 : vector<8x32xf32>
    %111 = arith.addf %110, %3 : vector<8x32xf32>
    %112 = arith.index_cast %c7_i32 : i32 to index
    %c0_52 = arith.constant 0 : index
    %c0_53 = arith.constant 0 : index
    %113 = vector.load %arg6[%112, %c0_52, %c0_53] : memref<8x8x32xf32, #tpu.memory_space<vmem>>, vector<1x8x32xf32>
    %114 = vector.shape_cast %113 : vector<1x8x32xf32> to vector<8x32xf32>
    %115 = vector.shape_cast %111 : vector<8x32xf32> to vector<1x8x32xf32>
    tpu.vector_store %arg6[%112, %c0_52, %c0_53], %115 {strides = array<i32>} : memref<8x8x32xf32, #tpu.memory_space<vmem>>, vector<1x8x32xf32>,
    %c8_i32 = arith.constant 8 : i32
    return
  }
  func.func @transform_0(%arg0: i32) -> (i32, i32, i32) {
    %c0_i32 = arith.constant 0 : i32
    %c0_i32_0 = arith.constant 0 : i32
    %c0_i32_1 = arith.constant 0 : i32
    return %arg0, %c0_i32, %c0_i32_0 : i32, i32, i32
  }
  func.func @transform_1(%arg0: i32) -> (i32, i32) {
    %c0_i32 = arith.constant 0 : i32
    %c0_i32_0 = arith.constant 0 : i32
    %c0_i32_1 = arith.constant 0 : i32
    return %c0_i32, %c0_i32_0 : i32, i32
  }
  func.func @transform_2(%arg0: i32) -> (i32, i32) {
    %c0_i32 = arith.constant 0 : i32
    %c0_i32_0 = arith.constant 0 : i32
    %c0_i32_1 = arith.constant 0 : i32
    return %c0_i32, %c0_i32_0 : i32, i32
  }
  func.func @transform_3(%arg0: i32) -> (i32, i32) {
    %c0_i32 = arith.constant 0 : i32
    %c0_i32_0 = arith.constant 0 : i32
    %c0_i32_1 = arith.constant 0 : i32
    return %c0_i32, %c0_i32_0 : i32, i32
  }
  func.func @transform_4(%arg0: i32) -> (i32, i32) {
    %c0_i32 = arith.constant 0 : i32
    %c0_i32_0 = arith.constant 0 : i32
    %c0_i32_1 = arith.constant 0 : i32
    return %c0_i32, %c0_i32_0 : i32, i32
  }
  func.func @transform_5(%arg0: i32) -> (i32, i32, i32) {
    %c0_i32 = arith.constant 0 : i32
    %c0_i32_0 = arith.constant 0 : i32
    %c0_i32_1 = arith.constant 0 : i32
    return %arg0, %c0_i32, %c0_i32_0 : i32, i32, i32
  }
}

</mosaic_0001>

<bundles_post_ra>
// kernel: tpu_custom_call.1
= control target key start
LH: loop header
LB: loop body
LE: loop exit
PB: predicated region body
PF: predicated region fallthrough
CT: control target
= control target key end

     0   :  { %10 = vsyncpa [#allocation3], 0  ;;  %s1711_s0 = inlined_call_operand.hbm [shape: f32[8,8,32], index: 0, kind: input, shape index: {}]   ;;  %s1712_s1 = inlined_call_operand.hbm [shape: f32[8,8], index: 1, kind: input, shape index: {}]   ;;  %s1713_s2 = inlined_call_operand.hbm [shape: f32[8,32], index: 2, kind: input, shape index: {}]   ;;  %s1714_s3 = inlined_call_operand.hbm [shape: f32[8,32], index: 3, kind: input, shape index: {}]   ;;  %s1715_s4 = inlined_call_operand.hbm [shape: f32[8,32], index: 4, kind: input, shape index: {}]   ;;  %s1716_s5 = inlined_call_operand.hbm [shape: f32[8,8,32], index: 5, kind: output, shape index: {}]  }
   0x1   :  { %11 = vsyncpa [#allocation6], 0 }
   0x2   :  { %12 = vsyncpa [#allocation9], 0  ;;  %s32_s20 = sshll.u32 %s1712_s1, 4  ;;  %s33_s20 = int_to_ptr.hbm [resolvable:$true] %s32_s20 }
   0x3   :  { %13 = vsyncpa [#allocation4], 0  ;;  %s1511_s21 = smov [#allocation5]   ;;  %s54_s25 = sshll.u32 %s1714_s3, 4  ;;  %s55_s25 = int_to_ptr.hbm [resolvable:$true] %s54_s25 }
   0x4   :  { %s34_s22 = sshll.u32 %s1511_s21, 4  ;;  %s1512_s26 = smov [#allocation8]   ;;  %s35_s22 = int_to_ptr.vmem [resolvable:$true] %s34_s22 }
   0x5   :  { %37 = dma.hbm_to_vmem [thread:$0]  %s33_s20, 128, %s35_s22, [#allocation6]  }
   0x6   :  { %s56_s27 = sshll.u32 %s1512_s26, 4  ;;  %s18_s30 = sshll.u32 %s1711_s0, 4  ;;  %s57_s27 = int_to_ptr.vmem [resolvable:$true] %s56_s27  ;;  %s19_s30 = int_to_ptr.hbm [resolvable:$true] %s18_s30 }
   0x7   :  { %59 = dma.hbm_to_vmem [thread:$0]  %s55_s25, 128, %s57_s27, [#allocation9]  }
   0x8   :  { %s1513_s1 = smov [#allocation2]   ;;  %s43_s9 = sshll.u32 %s1713_s2, 4  ;;  %s44_s9 = int_to_ptr.hbm [resolvable:$true] %s43_s9 }
   0x9   :  { %s20_s6 = sshll.u32 %s1513_s1, 4  ;;  %s1514_s10 = smov 128   ;;  %s21_s6 = int_to_ptr.vmem [resolvable:$true] %s20_s6 }
   0xa   :  { %s1515_s3 = smov 8   ;;  %s1516_s11 = smov [#allocation7]  }
   0xb   :  { %26 = dma.hbm_to_vmem [thread:$0]  %s19_s30, 1024, %s21_s6, [#allocation3], %s1514_s10, %s1514_s10, %s1515_s3  }
   0xc   :  { %s45_s12 = sshll.u32 %s1516_s11, 4  ;;  %s65_s14 = sshll.u32 %s1715_s4, 4  ;;  %s46_s12 = int_to_ptr.vmem [resolvable:$true] %s45_s12  ;;  %s66_s14 = int_to_ptr.hbm [resolvable:$true] %s65_s14 }
   0xd   :  { %48 = dma.hbm_to_vmem [thread:$0]  %s44_s9, 128, %s46_s12, [#allocation6]  }
   0xe   :  { %s1517_s15 = smov [#allocation10]  }
   0xf   :  { %s67_s16 = sshll.u32 %s1517_s15, 4  ;;  %s68_s16 = int_to_ptr.vmem [resolvable:$true] %s67_s16 }
  0x10   :  { %70 = dma.hbm_to_vmem [thread:$0]  %s66_s14, 128, %s68_s16, [#allocation9]  }
  0x11   :  { %1503 = dma.done.wait [#allocation3], 1024  }
  0x12   :  { %1504 = vsyncadd [#allocation3], 4294966272 }
  0x13   :  { %1505 = dma.done.wait [#allocation6], 256  }
  0x14   :  { %1506 = vsyncadd [#allocation6], 4294967040 }
  0x15   :  { %1507 = dma.done.wait [#allocation9], 256  }
  0x16   :  { %1508 = vsyncadd [#allocation9], 4294967040  ;;  %vm96_vm0 = vcmask 64512   ;;  %v1567_v0 = vld [vmem:[#allocation2] sm:$0xff]  ;;  %v1569_v2 = vld [vmem:[#allocation2 + $0x8] sm:$0xff]  ;;  %vm250_vm1 = vcmask 261120  }
  0x17   :  { %v91_v1 = vld [vmem:[#allocation5] sm:$0xff]  ;;  %v115_v3 = vand.u32 4294901760, %v1567_v0  ;;  %v269_v5 = vand.u32 4294901760, %v1569_v2  ;;  %v1573_v6 = vld [vmem:[#allocation2 + $0x10] sm:$0xff]  ;;  %v1578_v9 = vld [vmem:[#allocation2 + $0x18] sm:$0xff]  ;;  %s1518_s2 = smov [#allocation11]  }
  0x18   :  { %v98_v4 = vsel %vm96_vm0, %v91_v1, 0  ;;  %v423_v8 = vand.u32 4294901760, %v1573_v6  ;;  %v577_v16 = vand.u32 4294901760, %v1578_v9  ;;  %v1604_v31 = vld [vmem:[#allocation2 + $0x20] sm:$0xff]  ;;  %v1608_v33 = vld [vmem:[#allocation2 + $0x28] sm:$0xff]  ;;  %v1624_v43 = vld [vmem:[#allocation2 + $0x30] sm:$0xff] }
  0x19   :  { %v1575_v7 = vand.u32 4294901760, %v98_v4  ;;  %v142_v10 = vsub.f32 %v1567_v0, %v115_v3  ;;  %116 = vmatpush.msra.mxu0 %v115_v3  ;;  %192 = vmatpush.msra.mxu3 %v115_v3  ;;  %v296_v11 = vsub.f32 %v1569_v2, %v269_v5  ;;  %v731_v32 = vand.u32 4294901760, %v1604_v31  ;;  %v1628_v45 = vld [vmem:[#allocation2 + $0x38] sm:$0xff]  ;;  %v1659_v55 = vld [vmem:[#allocation7] sm:$0xff]  ;;  %s1334_s4 = sshll.u32 %s1518_s2, 4  ;;  %s1336_s19 = sshll.u32 %s1716_s5, 4  ;;  %s1335_s4 = int_to_ptr.vmem [resolvable:$true] %s1334_s4  ;;  %s1337_s19 = int_to_ptr.hbm [resolvable:$true] %s1336_s19 }
  0x1a   :  { %v450_v15 = vsub.f32 %v1573_v6, %v423_v8  ;;  %v604_v24 = vsub.f32 %v1578_v9, %v577_v16  ;;  %v885_v35 = vand.u32 4294901760, %v1608_v33  ;;  %v1039_v44 = vand.u32 4294901760, %v1624_v43 }
  0x1b   :  { %v1583_v12 = vsub.f32 %v98_v4, %v1575_v7  ;;  %169 = vmatpush.msra.mxu2 %v142_v10  ;;  %v143_v13 = vand.u32 4294901760, %v142_v10  ;;  %v297_v14 = vand.u32 4294901760, %v296_v11  ;;  %v758_v34 = vsub.f32 %v1604_v31, %v731_v32 }
  0x1c   :  { %v451_v23 = vand.u32 4294901760, %v450_v15  ;;  %v605_v27 = vand.u32 4294901760, %v604_v24  ;;  %v912_v37 = vsub.f32 %v1608_v33, %v885_v35  ;;  %v1066_v46 = vsub.f32 %v1624_v43, %v1039_v44 }
  0x1d   :  { %172 = vmatmul.f32.vlgmr.msra.gmra.mxu2 %v1583_v12  ;;  %v1589_v17 = vand.u32 4294901760, %v1583_v12  ;;  %218 = vmatpush.msrb.mxu0 %v143_v13  ;;  %v298_v18 = vsub.f32 %v296_v11, %v297_v14  ;;  %v144_v19 = vsub.f32 %v142_v10, %v143_v13  ;;  %v759_v36 = vand.u32 4294901760, %v758_v34  ;;  %v1663_v13 = vld [vmem:[#allocation8] sm:$0xff] }
  0x1e   :  { %270 = vmatpush.msrb.mxu2 %v269_v5  ;;  %v452_v26 = vsub.f32 %v450_v15, %v451_v23  ;;  %v606_v29 = vsub.f32 %v604_v24, %v605_v27  ;;  %v913_v39 = vand.u32 4294901760, %v912_v37  ;;  %v1193_v47 = vand.u32 4294901760, %v1628_v45 }
  0x1f   :  { %v120_v20 = vsub.f32 %v1583_v12, %v1589_v17  ;;  %196 = vmatmul.f32.vlgmr.msra.gmra.mxu3 %v1589_v17  ;;  %v299_v21 = vand.u32 4294901760, %v298_v18  ;;  %v145_v22 = vand.u32 4294901760, %v144_v19  ;;  %v760_v38 = vsub.f32 %v758_v34, %v759_v36 }
  0x20   :  { %372 = vmatpush.msra.mxu2 %v297_v14  ;;  %v453_v28 = vand.u32 4294901760, %v452_v26  ;;  %v607_v30 = vand.u32 4294901760, %v606_v29  ;;  %v914_v41 = vsub.f32 %v912_v37, %v913_v39  ;;  %v1067_v48 = vand.u32 4294901760, %v1066_v46 }
  0x21   :  { %v1595_v25 = vand.u32 4294901760, %v120_v20  ;;  %300 = vmatpush.msrb.mxu3 %v299_v21  ;;  %146 = vmatpush.msra.mxu1 %v145_v22  ;;  %v761_v40 = vand.u32 4294901760, %v760_v38  ;;  %v1220_v49 = vsub.f32 %v1628_v45, %v1193_v47 }
  0x22   :  { %148 = vmatmul.f32.vlgmr.msra.gmra.mxu1 %v1575_v7  ;;  %v915_v42 = vand.u32 4294901760, %v914_v41  ;;  %v1068_v50 = vsub.f32 %v1066_v46, %v1067_v48 }
  0x23   :  { %122 = vmatmul.f32.vlgmr.msra.gmra.mxu0 %v1595_v25  ;;  %240 = vmatpush.msrb.mxu1 %v115_v3  ;;  %v1221_v51 = vand.u32 4294901760, %v1220_v49 }
  0x24   :  { %323 = vmatpush.msra.mxu0 %v296_v11  ;;  %394 = vmatpush.msra.mxu3 %v269_v5  ;;  %v1069_v52 = vand.u32 4294901760, %v1068_v50 }
  0x25   :  { %276 = vmatmul.f32.vlgmr.msrb.gmra.mxu2 %v1595_v25  ;;  %346 = vmatpush.msra.mxu1 %v269_v5  ;;  %v1222_v53 = vsub.f32 %v1220_v49, %v1221_v51 }
  0x26   :  { %477 = vmatpush.msrb.mxu2 %v450_v15  ;;  %v1666_v15 = vld [vmem:[#allocation10] sm:$0xff] }
  0x27   :  { %302 = vmatmul.f32.vlgmr.msrb.gmra.mxu3 %v1575_v7  ;;  %v1223_v54 = vand.u32 4294901760, %v1222_v53 }
  0x28   :  { %500 = vmatpush.msrb.mxu3 %v423_v8 }
  0x2a   :  { %242 = vmatmul.f32.vlgmr.msrb.gmra.mxu1 %v1575_v7 }
  0x2b   :  { %220 = vmatmul.f32.vlgmr.msrb.gmra.mxu0 %v1575_v7  ;;  %454 = vmatpush.msrb.mxu1 %v453_v28 }
  0x2c   :  { %424 = vmatpush.msrb.mxu0 %v423_v8 }
  0x2d   :  { %374 = vmatmul.f32.vlgmr.msra.gmra.mxu2 %v1575_v7 }
  0x2e   :  { %578 = vmatpush.msra.mxu2 %v577_v16 }
  0x2f   :  { %396 = vmatmul.f32.vlgmr.msra.gmra.mxu3 %v1575_v7 }
  0x30   :  { %608 = vmatpush.msra.mxu3 %v607_v30 }
  0x32   :  { %350 = vmatmul.f32.vlgmr.msra.gmra.mxu1 %v1589_v17 }
  0x33   :  { %326 = vmatmul.f32.vlgmr.msra.gmra.mxu0 %v1583_v12  ;;  %548 = vmatpush.msra.mxu1 %v423_v8 }
  0x34   :  { %526 = vmatpush.msra.mxu0 %v451_v23 }
  0x35   :  { %480 = vmatmul.f32.vlgmr.msrb.gmra.mxu2 %v1583_v12 }
  0x36   :  { %680 = vmatpush.msrb.mxu2 %v605_v27 }
  0x37   :  { %504 = vmatmul.f32.vlgmr.msrb.gmra.mxu3 %v1589_v17 }
  0x38   :  { %702 = vmatpush.msrb.mxu3 %v577_v16 }
  0x3a   :  { %456 = vmatmul.f32.vlgmr.msrb.gmra.mxu1 %v1575_v7 }
  0x3b   :  { %430 = vmatmul.f32.vlgmr.msrb.gmra.mxu0 %v1595_v25  ;;  %654 = vmatpush.msrb.mxu1 %v577_v16 }
  0x3c   :  { %631 = vmatpush.msrb.mxu0 %v604_v24 }
  0x3d   :  { %584 = vmatmul.f32.vlgmr.msra.gmra.mxu2 %v1595_v25 }
  0x3e   :  { %785 = vmatpush.msra.mxu2 %v758_v34 }
  0x3f   :  { %610 = vmatmul.f32.vlgmr.msra.gmra.mxu3 %v1575_v7 }
  0x40   :  { %808 = vmatpush.msra.mxu3 %v731_v32 }
  0x42   :  { %550 = vmatmul.f32.vlgmr.msra.gmra.mxu1 %v1575_v7 }
  0x43   :  { %528 = vmatmul.f32.vlgmr.msra.gmra.mxu0 %v1575_v7  ;;  %762 = vmatpush.msra.mxu1 %v761_v40 }
  0x44   :  { %732 = vmatpush.msra.mxu0 %v731_v32 }
  0x45   :  { %682 = vmatmul.f32.vlgmr.msrb.gmra.mxu2 %v1575_v7 }
  0x46   :  { %886 = vmatpush.msrb.mxu2 %v885_v35 }
  0x47   :  { %704 = vmatmul.f32.vlgmr.msrb.gmra.mxu3 %v1575_v7 }
  0x48   :  { %916 = vmatpush.msrb.mxu3 %v915_v42 }
  0x4a   :  { %658 = vmatmul.f32.vlgmr.msrb.gmra.mxu1 %v1589_v17 }
  0x4b   :  { %634 = vmatmul.f32.vlgmr.msrb.gmra.mxu0 %v1583_v12  ;;  %856 = vmatpush.msrb.mxu1 %v731_v32 }
  0x4c   :  { %834 = vmatpush.msrb.mxu0 %v759_v36 }
  0x4d   :  { %788 = vmatmul.f32.vlgmr.msra.gmra.mxu2 %v1583_v12 }
  0x4e   :  { %988 = vmatpush.msra.mxu2 %v913_v39 }
  0x4f   :  { %812 = vmatmul.f32.vlgmr.msra.gmra.mxu3 %v1589_v17 }
  0x50   :  { %1010 = vmatpush.msra.mxu3 %v885_v35 }
  0x52   :  { %764 = vmatmul.f32.vlgmr.msra.gmra.mxu1 %v1575_v7 }
  0x53   :  { %738 = vmatmul.f32.vlgmr.msra.gmra.mxu0 %v1595_v25  ;;  %962 = vmatpush.msra.mxu1 %v885_v35 }
  0x54   :  { %939 = vmatpush.msra.mxu0 %v912_v37 }
  0x55   :  { %892 = vmatmul.f32.vlgmr.msrb.gmra.mxu2 %v1595_v25 }
  0x56   :  { %1093 = vmatpush.msrb.mxu2 %v1066_v46 }
  0x57   :  { %918 = vmatmul.f32.vlgmr.msrb.gmra.mxu3 %v1575_v7 }
  0x58   :  { %1116 = vmatpush.msrb.mxu3 %v1039_v44 }
  0x5a   :  { %858 = vmatmul.f32.vlgmr.msrb.gmra.mxu1 %v1575_v7 }
  0x5b   :  { %836 = vmatmul.f32.vlgmr.msrb.gmra.mxu0 %v1575_v7  ;;  %1070 = vmatpush.msrb.mxu1 %v1069_v52 }
  0x5c   :  { %1040 = vmatpush.msrb.mxu0 %v1039_v44 }
  0x5d   :  { %990 = vmatmul.f32.vlgmr.msra.gmra.mxu2 %v1575_v7 }
  0x5e   :  { %1194 = vmatpush.msra.mxu2 %v1193_v47 }
  0x5f   :  { %1012 = vmatmul.f32.vlgmr.msra.gmra.mxu3 %v1575_v7 }
  0x60   :  { %1224 = vmatpush.msra.mxu3 %v1223_v54 }
  0x62   :  { %966 = vmatmul.f32.vlgmr.msra.gmra.mxu1 %v1589_v17 }
  0x63   :  { %942 = vmatmul.f32.vlgmr.msra.gmra.mxu0 %v1583_v12  ;;  %1164 = vmatpush.msra.mxu1 %v1039_v44 }
  0x64   :  { %1142 = vmatpush.msra.mxu0 %v1067_v48 }
  0x65   :  { %1096 = vmatmul.f32.vlgmr.msrb.gmra.mxu2 %v1583_v12 }
  0x66   :  { %1296 = vmatpush.msrb.mxu2 %v1221_v51 }
  0x67   :  { %1120 = vmatmul.f32.vlgmr.msrb.gmra.mxu3 %v1589_v17 }
  0x68   :  { %1318 = vmatpush.msrb.mxu3 %v1193_v47 }
  0x6a   :  { %1072 = vmatmul.f32.vlgmr.msrb.gmra.mxu1 %v1575_v7 }
  0x6b   :  { %1046 = vmatmul.f32.vlgmr.msrb.gmra.mxu0 %v1595_v25  ;;  %1270 = vmatpush.msrb.mxu1 %v1193_v47 }
  0x6c   :  { %1247 = vmatpush.msrb.mxu0 %v1220_v49 }
  0x6d   :  { %1200 = vmatmul.f32.vlgmr.msra.gmra.mxu2 %v1595_v25 }
  0x6f   :  { %1226 = vmatmul.f32.vlgmr.msra.gmra.mxu3 %v1575_v7 }
  0x72   :  { %1166 = vmatmul.f32.vlgmr.msra.gmra.mxu1 %v1575_v7 }
  0x73   :  { %1144 = vmatmul.f32.vlgmr.msra.gmra.mxu0 %v1575_v7 }
  0x75   :  { %1298 = vmatmul.f32.vlgmr.msrb.gmra.mxu2 %v1575_v7 }
  0x77   :  { %1320 = vmatmul.f32.vlgmr.msrb.gmra.mxu3 %v1575_v7 }
  0x7a   :  { %1274 = vmatmul.f32.vlgmr.msrb.gmra.mxu1 %v1589_v17 }
  0x7b   :  { %1250 = vmatmul.f32.vlgmr.msrb.gmra.mxu0 %v1583_v12 }
  0x9f   :  { %v149_v57 = vpop.f32.mrf.mxu1 }
  0xa0   :  { %v123_v56 = vpop.f32.mrf.mxu0  ;;  %v173_v59 = vpop.f32.mrf.mxu2 }
  0xa1   :  { %v124_v58 = vadd.f32 %v123_v56, %v1659_v55 }
  0xa2   :  { %v197_v60 = vpop.f32.mrf.mxu3 }
  0xa3   :  { %v150_v61 = vadd.f32 %v149_v57, %v124_v58 }
  0xa5   :  { %v174_v62 = vadd.f32 %v173_v59, %v150_v61 }
  0xa7   :  { %v198_v63 = vadd.f32 %v197_v60, %v174_v62  ;;  %v243_v3 = vpop.f32.mrf.mxu1 }
  0xa8   :  { %v221_v1 = vpop.f32.mrf.mxu0  ;;  %v277_v5 = vpop.f32.mrf.mxu2 }
  0xa9   :  { %v222_v4 = vadd.f32 %v221_v1, %v198_v63  ;;  %v278_v7 = vadd.f32 %v277_v5, %v1659_v55 }
  0xaa   :  { %v303_v8 = vpop.f32.mrf.mxu3 }
  0xab   :  { %v244_v10 = vadd.f32 %v243_v3, %v222_v4  ;;  %v304_v12 = vadd.f32 %v303_v8, %v278_v7 }
  0xad   :  { %v246_v11 = vmax.f32 %v244_v10, 0.0 }
  0xaf   :  { %v247_v14 = vadd.f32 %v246_v11, %v1567_v0  ;;  %v351_v17 = vpop.f32.mrf.mxu1 }
  0xb0   :  { %v327_v16 = vpop.f32.mrf.mxu0  ;;  %v375_v20 = vpop.f32.mrf.mxu2 }
  0xb1   :  { %v248_v18 = vmul.f32 %v247_v14, %v1663_v13  ;;  %v328_v19 = vadd.f32 %v327_v16, %v304_v12 }
  0xb2   :  { %v397_v21 = vpop.f32.mrf.mxu3 }
  0xb3   :  { %v249_v22 = vadd.f32 %v248_v18, %v1666_v15  ;;  %v352_v23 = vadd.f32 %v351_v17, %v328_v19 }
  0xb5   :  { %251 = vst.msk [vmem:[#allocation11] sm:$0xff] %vm250_vm1, %v249_v22  ;;  %v376_v24 = vadd.f32 %v375_v20, %v352_v23 }
  0xb7   :  { %v398_v25 = vadd.f32 %v397_v21, %v376_v24  ;;  %v457_v27 = vpop.f32.mrf.mxu1 }
  0xb8   :  { %v431_v26 = vpop.f32.mrf.mxu0  ;;  %v481_v29 = vpop.f32.mrf.mxu2 }
  0xb9   :  { %v400_v0 = vmax.f32 %v398_v25, 0.0  ;;  %v432_v28 = vadd.f32 %v431_v26, %v1659_v55 }
  0xba   :  { %v505_v30 = vpop.f32.mrf.mxu3 }
  0xbb   :  { %v401_v32 = vadd.f32 %v400_v0, %v1569_v2  ;;  %v458_v34 = vadd.f32 %v457_v27, %v432_v28 }
  0xbd   :  { %v402_v35 = vmul.f32 %v401_v32, %v1663_v13  ;;  %v482_v36 = vadd.f32 %v481_v29, %v458_v34 }
  0xbf   :  { %v403_v37 = vadd.f32 %v402_v35, %v1666_v15  ;;  %v506_v38 = vadd.f32 %v505_v30, %v482_v36  ;;  %v551_v40 = vpop.f32.mrf.mxu1 }
  0xc0   :  { %v529_v39 = vpop.f32.mrf.mxu0  ;;  %v585_v42 = vpop.f32.mrf.mxu2 }
  0xc1   :  { %405 = vst.msk [vmem:[#allocation11 + $0x8] sm:$0xff] %vm250_vm1, %v403_v37  ;;  %v530_v41 = vadd.f32 %v529_v39, %v506_v38  ;;  %v586_v44 = vadd.f32 %v585_v42, %v1659_v55 }
  0xc2   :  { %v611_v46 = vpop.f32.mrf.mxu3 }
  0xc3   :  { %v552_v47 = vadd.f32 %v551_v40, %v530_v41  ;;  %v612_v49 = vadd.f32 %v611_v46, %v586_v44 }
  0xc5   :  { %v554_v48 = vmax.f32 %v552_v47, 0.0 }
  0xc7   :  { %v555_v2 = vadd.f32 %v554_v48, %v1573_v6  ;;  %v659_v51 = vpop.f32.mrf.mxu1 }
  0xc8   :  { %v635_v50 = vpop.f32.mrf.mxu0  ;;  %v683_v54 = vpop.f32.mrf.mxu2 }
  0xc9   :  { %v556_v52 = vmul.f32 %v555_v2, %v1663_v13  ;;  %v636_v53 = vadd.f32 %v635_v50, %v612_v49 }
  0xca   :  { %v705_v56 = vpop.f32.mrf.mxu3 }
  0xcb   :  { %v557_v57 = vadd.f32 %v556_v52, %v1666_v15  ;;  %v660_v58 = vadd.f32 %v659_v51, %v636_v53 }
  0xcd   :  { %559 = vst.msk [vmem:[#allocation11 + $0x10] sm:$0xff] %vm250_vm1, %v557_v57  ;;  %v684_v59 = vadd.f32 %v683_v54, %v660_v58 }
  0xcf   :  { %v706_v60 = vadd.f32 %v705_v56, %v684_v59  ;;  %v765_v62 = vpop.f32.mrf.mxu1 }
  0xd0   :  { %v739_v61 = vpop.f32.mrf.mxu0  ;;  %v789_v6 = vpop.f32.mrf.mxu2 }
  0xd1   :  { %v708_v63 = vmax.f32 %v706_v60, 0.0  ;;  %v740_v1 = vadd.f32 %v739_v61, %v1659_v55 }
  0xd2   :  { %v813_v3 = vpop.f32.mrf.mxu3 }
  0xd3   :  { %v709_v4 = vadd.f32 %v708_v63, %v1578_v9  ;;  %v766_v5 = vadd.f32 %v765_v62, %v740_v1 }
  0xd5   :  { %v710_v7 = vmul.f32 %v709_v4, %v1663_v13  ;;  %v790_v8 = vadd.f32 %v789_v6, %v766_v5 }
  0xd7   :  { %v711_v10 = vadd.f32 %v710_v7, %v1666_v15  ;;  %v814_v11 = vadd.f32 %v813_v3, %v790_v8  ;;  %v859_v14 = vpop.f32.mrf.mxu1 }
  0xd8   :  { %v837_v12 = vpop.f32.mrf.mxu0  ;;  %v893_v17 = vpop.f32.mrf.mxu2 }
  0xd9   :  { %713 = vst.msk [vmem:[#allocation11 + $0x18] sm:$0xff] %vm250_vm1, %v711_v10  ;;  %v838_v16 = vadd.f32 %v837_v12, %v814_v11  ;;  %v894_v18 = vadd.f32 %v893_v17, %v1659_v55 }
  0xda   :  { %v919_v19 = vpop.f32.mrf.mxu3 }
  0xdb   :  { %v860_v20 = vadd.f32 %v859_v14, %v838_v16  ;;  %v920_v22 = vadd.f32 %v919_v19, %v894_v18 }
  0xdd   :  { %v862_v21 = vmax.f32 %v860_v20, 0.0 }
  0xdf   :  { %v863_v9 = vadd.f32 %v862_v21, %v1604_v31  ;;  %v967_v24 = vpop.f32.mrf.mxu1 }
  0xe0   :  { %v943_v23 = vpop.f32.mrf.mxu0  ;;  %v991_v27 = vpop.f32.mrf.mxu2 }
  0xe1   :  { %v864_v25 = vmul.f32 %v863_v9, %v1663_v13  ;;  %v944_v26 = vadd.f32 %v943_v23, %v920_v22 }
  0xe2   :  { %v1013_v0 = vpop.f32.mrf.mxu3 }
  0xe3   :  { %v865_v28 = vadd.f32 %v864_v25, %v1666_v15  ;;  %v968_v29 = vadd.f32 %v967_v24, %v944_v26 }
  0xe5   :  { %867 = vst.msk [vmem:[#allocation11 + $0x20] sm:$0xff] %vm250_vm1, %v865_v28  ;;  %v992_v30 = vadd.f32 %v991_v27, %v968_v29 }
  0xe7   :  { %v1014_v32 = vadd.f32 %v1013_v0, %v992_v30  ;;  %v1073_v35 = vpop.f32.mrf.mxu1 }
  0xe8   :  { %v1047_v34 = vpop.f32.mrf.mxu0  ;;  %v1097_v31 = vpop.f32.mrf.mxu2 }
  0xe9   :  { %v1016_v36 = vmax.f32 %v1014_v32, 0.0  ;;  %v1048_v37 = vadd.f32 %v1047_v34, %v1659_v55 }
  0xea   :  { %v1121_v38 = vpop.f32.mrf.mxu3 }
  0xeb   :  { %v1017_v39 = vadd.f32 %v1016_v36, %v1608_v33  ;;  %v1074_v40 = vadd.f32 %v1073_v35, %v1048_v37 }
  0xed   :  { %v1018_v41 = vmul.f32 %v1017_v39, %v1663_v13  ;;  %v1098_v42 = vadd.f32 %v1097_v31, %v1074_v40 }
  0xef   :  { %v1019_v44 = vadd.f32 %v1018_v41, %v1666_v15  ;;  %v1122_v46 = vadd.f32 %v1121_v38, %v1098_v42  ;;  %v1167_v48 = vpop.f32.mrf.mxu1 }
  0xf0   :  { %v1145_v47 = vpop.f32.mrf.mxu0  ;;  %v1201_v2 = vpop.f32.mrf.mxu2 }
  0xf1   :  { %1021 = vst.msk [vmem:[#allocation11 + $0x28] sm:$0xff] %vm250_vm1, %v1019_v44  ;;  %v1146_v49 = vadd.f32 %v1145_v47, %v1122_v46  ;;  %v1202_v50 = vadd.f32 %v1201_v2, %v1659_v55 }
  0xf2   :  { %v1227_v51 = vpop.f32.mrf.mxu3 }
  0xf3   :  { %v1168_v52 = vadd.f32 %v1167_v48, %v1146_v49  ;;  %v1228_v54 = vadd.f32 %v1227_v51, %v1202_v50 }
  0xf5   :  { %v1170_v53 = vmax.f32 %v1168_v52, 0.0 }
  0xf7   :  { %v1171_v33 = vadd.f32 %v1170_v53, %v1624_v43  ;;  %v1275_v57 = vpop.f32.mrf.mxu1 }
  0xf8   :  { %v1251_v56 = vpop.f32.mrf.mxu0  ;;  %v1299_v60 = vpop.f32.mrf.mxu2 }
  0xf9   :  { %v1172_v58 = vmul.f32 %v1171_v33, %v1663_v13  ;;  %v1252_v59 = vadd.f32 %v1251_v56, %v1228_v54 }
  0xfa   :  { %v1321_v63 = vpop.f32.mrf.mxu3 }
  0xfb   :  { %v1173_v61 = vadd.f32 %v1172_v58, %v1666_v15  ;;  %v1276_v62 = vadd.f32 %v1275_v57, %v1252_v59 }
  0xfd   :  { %1175 = vst.msk [vmem:[#allocation11 + $0x30] sm:$0xff] %vm250_vm1, %v1173_v61  ;;  %v1300_v1 = vadd.f32 %v1299_v60, %v1276_v62 }
  0xff   :  { %v1322_v55 = vadd.f32 %v1321_v63, %v1300_v1 }
 0x101   :  { %v1324_v6 = vmax.f32 %v1322_v55, 0.0 }
 0x103   :  { %v1325_v3 = vadd.f32 %v1324_v6, %v1628_v45 }
 0x105   :  { %v1326_v43 = vmul.f32 %v1325_v3, %v1663_v13 }
 0x107   :  { %v1327_v4 = vadd.f32 %v1326_v43, %v1666_v15 }
 0x109   :  { %1329 = vst.msk [vmem:[#allocation11 + $0x38] sm:$0xff] %vm250_vm1, %v1327_v4 }
 0x10a   :  { %1342 = dma.vmem_to_hbm [thread:$0]  %s1335_s4, 1024, %s1337_s19, [#allocation4], %s1514_s10, %s1514_s10, %s1515_s3  }
 0x10b   :  { %1509 = dma.done.wait [#allocation4], 1024  }
 0x10c   :  { %1510 = vsyncadd [#allocation4], 4294966272 }
 0x10d   :  { %1347 = vsyncpa [#allocation3], 1 }
 0x10e   :  { %1348 = vsyncpa [#allocation6], 1 }
 0x10f   :  { %1349 = vsyncpa [#allocation9], 1 }
 0x110   :  { %1350 = vsyncpa [#allocation4], 1 }

</bundles_post_ra>
